<compile_context>
chip_gen: v7x
topology: tpu7x:2x2x1
jax: 0.10.0
libtpu: 0.0.40
codegen_flags: <defaults>
</compile_context>

<pallas_src>
import functools

import jax
import jax.numpy as jnp
from jax.experimental import pallas as pl
from jax.experimental.pallas import tpu as pltpu


def _attention_kernel(x_ref, w_ref, ws_ref, aw_ref, *, chunks):
    # x_ref:  (BT, S, D) VMEM   batch tile of inputs
    # w_ref:  (1, D)     VMEM   Linear weight (out_features=1), resident across the grid
    # ws_ref: (BT, D)    VMEM   weighted-sum output tile (lane-dense)
    # aw_ref: (BT, S)    VMEM   attention-weights output tile (lane-dense)
    bt, _, d = x_ref.shape
    w = w_ref[...].astype(jnp.float32).reshape(1, 1, d)   # broadcasts over (BT, sc, D)

    # Pass 1: attention scores, chunked along S (VPU multiply + lane reduce over D).
    # Chunking bounds the f32 temporaries to ~1 MiB instead of a full-block f32 copy.
    score_chunks = []
    for c0, sc in chunks:
        x_c = x_ref[:, pl.ds(c0, sc), :].astype(jnp.float32)        # (BT, sc, D) f32
        score_chunks.append(jnp.sum(x_c * w, axis=-1))              # (BT, sc)

    # Softmax over the sequence axis (per-row; kept chunked, no concatenate / transpose).
    m = score_chunks[0].max(axis=-1, keepdims=True)                 # (BT, 1)
    for s_c in score_chunks[1:]:
        m = jnp.maximum(m, s_c.max(axis=-1, keepdims=True))
    exp_chunks = []
    denom = jnp.zeros_like(m)
    for s_c in score_chunks:
        e_c = jnp.exp(s_c - m)
        exp_chunks.append(e_c)
        denom = denom + jnp.sum(e_c, axis=-1, keepdims=True)
    inv = 1.0 / denom                                               # exact: weights sum to 1

    # Pass 2: write the weights and accumulate the weighted sum over S-chunks.
    acc = jnp.zeros((bt, d), jnp.float32)
    for (c0, sc), e_c in zip(chunks, exp_chunks):
        wgt_c = e_c * inv                                           # (BT, sc)
        aw_ref[:, pl.ds(c0, sc)] = wgt_c.astype(aw_ref.dtype)
        x_c = x_ref[:, pl.ds(c0, sc), :].astype(jnp.float32)        # (BT, sc, D) f32
        acc = acc + jnp.sum(wgt_c[:, :, None] * x_c, axis=1)        # sublane reduce over sc
    ws_ref[...] = acc.astype(ws_ref.dtype)


def _round_up8(n):
    return ((int(n) + 7) // 8) * 8


def _vmem_budget_bytes():
    """Scoped-VMEM budget per TPU generation (conservative if detection fails)."""
    kind = ""
    try:
        kind = jax.devices()[0].device_kind.lower()
    except Exception:
        pass
    if "v7" in kind:
        return 48 * 1024 * 1024       # v7x: 64 MiB VMEM per TensorCore
    if "v5" in kind or "v6" in kind:
        return 96 * 1024 * 1024       # v5e/v6e: 128 MiB physical VMEM
    return 48 * 1024 * 1024           # unknown: stay conservative


def _pick_b_tile(B, S, D, x_itemsize, out_itemsize, budget_bytes):
    """Largest multiple-of-8 batch tile that fits the VMEM budget (double-buffered blocks
    + small f32 accumulators), capped to the batch and to >= ~4 grid steps when possible."""
    usable = int(budget_bytes * 0.75)           # headroom for compiler scratch / spills
    chunk_overhead = 4 * (1 << 20)              # ~2 in-flight f32 S-chunk temporaries
    per_row = (2 * S * D * x_itemsize           # x block, double-buffered
               + 2 * D * out_itemsize           # weighted-sum block, double-buffered
               + 2 * S * out_itemsize           # weights block, double-buffered
               + (2 * S + D) * 4)               # f32 score/exp chunks + f32 accumulator
    bt = (usable - chunk_overhead) // per_row
    bt = max(8, (bt // 8) * 8)
    bt = min(bt, max(8, (B // 8) * 8))          # don't exceed the batch
    if B >= 32:                                 # keep >= ~4 grid steps (2 TCs on v7x)
        bt = min(bt, _round_up8(pl.cdiv(B, 4)))
    return int(bt)


def _s_chunks(b_tile, S, D, target_bytes=1 << 20, max_chunks=32):
    """Static S-chunking so per-chunk f32 temporaries stay ~target_bytes."""
    per_s = max(1, b_tile * D * 4)              # f32 bytes per unit of S in a chunk temp
    sc = max(8, (target_bytes // per_s) // 8 * 8)
    sc = max(sc, _round_up8(pl.cdiv(S, max_chunks)))
    sc = min(sc, S)
    chunks = []
    c0 = 0
    while c0 < S:
        chunks.append((c0, min(sc, S - c0)))
        c0 += sc
    return tuple(chunks)


def attention_layer(x, weight, bias=None, *, b_tile=None):
    """x: (B, S, D); weight: (1, D); bias: (1,) (unused: softmax is shift-invariant).
    Returns (weighted_sum (B, D), attn_weights (B, 1, S)) in x.dtype."""
    del bias  # scalar bias shifts every score equally -> no effect on weights / output
    B, S, D = x.shape
    w2 = weight.reshape(1, D)

    budget = _vmem_budget_bytes()
    x_itemsize = jnp.dtype(x.dtype).itemsize
    if b_tile is None:
        b_tile = _pick_b_tile(B, S, D, x_itemsize, x_itemsize, budget)
    else:
        b_tile = max(8, (int(b_tile) // 8) * 8)
    chunks = _s_chunks(b_tile, S, D)

    # Ragged trailing block handled by Pallas -> no wrapper-side pad / output slice copies.
    grid = (pl.cdiv(B, b_tile),)

    grid_spec = pltpu.PrefetchScalarGridSpec(
        num_scalar_prefetch=0,
        grid=grid,
        in_specs=[
            pl.BlockSpec((b_tile, S, D), lambda i: (i, 0, 0)),   # x batch tile
            pl.BlockSpec((1, D), lambda i: (0, 0)),              # weight, resident
        ],
        out_specs=[
            pl.BlockSpec((b_tile, D), lambda i: (i, 0)),         # weighted-sum tile
            pl.BlockSpec((b_tile, S), lambda i: (i, 0)),         # attn-weights tile
        ],
    )
    ws, aw = pl.pallas_call(
        functools.partial(_attention_kernel, chunks=chunks),
        out_shape=(
            jax.ShapeDtypeStruct((B, D), x.dtype),               # lane-dense output slabs
            jax.ShapeDtypeStruct((B, S), x.dtype),
        ),
        grid_spec=grid_spec,
        compiler_params=pltpu.CompilerParams(
            dimension_semantics=("parallel",),
            vmem_limit_bytes=budget,
        ),
    )(x, w2)
    return ws, aw.reshape(B, 1, S)


def _reference(x, weight, bias):
    # pure-JAX reference reproducing the PyTorch forward (mask=None path)
    scores = jnp.einsum("bsd,od->bso", x, weight) + bias      # (B, S, 1)
    scores = scores.reshape(x.shape[0], x.shape[1])           # (B, S)
    wts = jax.nn.softmax(scores, axis=-1)[:, None, :]         # (B, 1, S)
    out = jnp.einsum("bls,bsd->bld", wts, x)[:, 0, :]         # (B, D)
    return out, wts


if __name__ == "__main__":
    key = jax.random.PRNGKey(0)
    B, S, D = 10, 8, 32   # B not a multiple of the batch tile -> exercises the ragged block

    kx, kw, kb = jax.random.split(key, 3)
    x = jax.random.normal(kx, (B, S, D), dtype=jnp.float32)
    # deterministic init of nn.Linear(D, 1) parameters
    bound = 1.0 / (D ** 0.5)
    weight = jax.random.uniform(kw, (1, D), minval=-bound, maxval=bound, dtype=jnp.float32)
    bias = jax.random.uniform(kb, (1,), minval=-bound, maxval=bound, dtype=jnp.float32)

    weighted_sum, attn_weights = attention_layer(x, weight, bias)
    jax.block_until_ready((weighted_sum, attn_weights))

    ref_ws, ref_aw = _reference(x, weight, bias)
    assert weighted_sum.shape == (B, D)
    assert attn_weights.shape == (B, 1, S)
    assert jnp.allclose(weighted_sum, ref_ws, atol=1e-4, rtol=1e-4), \
        float(jnp.max(jnp.abs(weighted_sum - ref_ws)))
    assert jnp.allclose(attn_weights, ref_aw, atol=1e-4, rtol=1e-4), \
        float(jnp.max(jnp.abs(attn_weights - ref_aw)))

    print("KERNEL_OK")
</pallas_src>

<mosaic_0001>
module attributes {stable_mosaic.version = 11 : i64} {
  func.func @_attention_kernel(%arg0: i32, %arg1: memref<8x8x32xf32, #tpu.memory_space<vmem>>, %arg2: memref<1x32xf32, #tpu.memory_space<vmem>>, %arg3: memref<8x32xf32, #tpu.memory_space<vmem>>, %arg4: memref<8x8xf32, #tpu.memory_space<vmem>>) attributes {dimension_semantics = [#tpu.dimension_semantics<parallel>], iteration_bounds = array<i64: 2>, scalar_prefetch = 0 : i64, scratch_operands = 0 : i64, tpu.core_type = #tpu.core_type<tc>, window_params = [{transform_indices = @transform_0, window_bounds = array<i64: 8, 8, 32>}, {pipeline_mode = #tpu.pipeline_mode<synchronous>, transform_indices = @transform_1, window_bounds = array<i64: 1, 32>}, {transform_indices = @transform_2, window_bounds = array<i64: 8, 32>}, {transform_indices = @transform_3, window_bounds = array<i64: 8, 8>}]} {
    %c0 = arith.constant 0 : index
    %c0_0 = arith.constant 0 : index
    %0 = vector.load %arg2[%c0, %c0_0] : memref<1x32xf32, #tpu.memory_space<vmem>>, vector<1x32xf32>
    %1 = vector.shape_cast %0 : vector<1x32xf32> to vector<1x1x32xf32>
    %c0_1 = arith.constant 0 : index
    %c0_2 = arith.constant 0 : index
    %c0_3 = arith.constant 0 : index
    %2 = vector.load %arg1[%c0_1, %c0_2, %c0_3] : memref<8x8x32xf32, #tpu.memory_space<vmem>>, vector<8x8x32xf32>
    %3 = vector.broadcast %1 : vector<1x1x32xf32> to vector<8x8x32xf32>
    %4 = arith.mulf %2, %3 : vector<8x8x32xf32>
    %cst = arith.constant dense<0.000000e+00> : vector<8x8xf32>
    %5 = vector.multi_reduction <add>, %4, %cst [2] : vector<8x8x32xf32> to vector<8x8xf32>
    %cst_4 = arith.constant dense<0xFF800000> : vector<8xf32>
    %6 = vector.multi_reduction <maximumf>, %5, %cst_4 [1] : vector<8x8xf32> to vector<8xf32>
    %7 = vector.shape_cast %6 : vector<8xf32> to vector<8x1xf32>
    %cst_5 = arith.constant 0.000000e+00 : f32
    %8 = vector.broadcast %cst_5 : f32 to vector<8x1xf32>
    %9 = vector.broadcast %7 : vector<8x1xf32> to vector<8x8xf32>
    %10 = arith.subf %5, %9 : vector<8x8xf32>
    %11 = math.exp %10 : vector<8x8xf32>
    %cst_6 = arith.constant dense<0.000000e+00> : vector<8xf32>
    %12 = vector.multi_reduction <add>, %11, %cst_6 [1] : vector<8x8xf32> to vector<8xf32>
    %13 = vector.shape_cast %12 : vector<8xf32> to vector<8x1xf32>
    %14 = arith.addf %8, %13 : vector<8x1xf32>
    %cst_7 = arith.constant 1.000000e+00 : f32
    %15 = vector.broadcast %cst_7 : f32 to vector<8x1xf32>
    %16 = arith.divf %15, %14 : vector<8x1xf32>
    %cst_8 = arith.constant 0.000000e+00 : f32
    %17 = vector.broadcast %cst_8 : f32 to vector<8x32xf32>
    %18 = vector.broadcast %16 : vector<8x1xf32> to vector<8x8xf32>
    %19 = arith.mulf %11, %18 : vector<8x8xf32>
    %c0_9 = arith.constant 0 : index
    %c0_10 = arith.constant 0 : index
    %20 = vector.load %arg4[%c0_9, %c0_10] : memref<8x8xf32, #tpu.memory_space<vmem>>, vector<8x8xf32>
    tpu.vector_store %arg4[%c0_9, %c0_10], %19 {strides = array<i32>} : memref<8x8xf32, #tpu.memory_space<vmem>>, vector<8x8xf32>,
    %c0_11 = arith.constant 0 : index
    %c0_12 = arith.constant 0 : index
    %c0_13 = arith.constant 0 : index
    %21 = vector.load %arg1[%c0_11, %c0_12, %c0_13] : memref<8x8x32xf32, #tpu.memory_space<vmem>>, vector<8x8x32xf32>
    %22 = vector.shape_cast %19 : vector<8x8xf32> to vector<8x8x1xf32>
    %23 = vector.broadcast %22 : vector<8x8x1xf32> to vector<8x8x32xf32>
    %24 = arith.mulf %23, %21 : vector<8x8x32xf32>
    %cst_14 = arith.constant dense<0.000000e+00> : vector<8x32xf32>
    %25 = vector.multi_reduction <add>, %24, %cst_14 [1] : vector<8x8x32xf32> to vector<8x32xf32>
    %26 = arith.addf %17, %25 : vector<8x32xf32>
    %c0_15 = arith.constant 0 : index
    %c0_16 = arith.constant 0 : index
    %27 = vector.load %arg3[%c0_15, %c0_16] : memref<8x32xf32, #tpu.memory_space<vmem>>, vector<8x32xf32>
    tpu.vector_store %arg3[%c0_15, %c0_16], %26 {strides = array<i32>} : memref<8x32xf32, #tpu.memory_space<vmem>>, vector<8x32xf32>,
    return
  }
  func.func @transform_0(%arg0: i32) -> (i32, i32, i32) {
    %c0_i32 = arith.constant 0 : i32
    %c0_i32_0 = arith.constant 0 : i32
    %c0_i32_1 = arith.constant 0 : i32
    return %arg0, %c0_i32, %c0_i32_0 : i32, i32, i32
  }
  func.func @transform_1(%arg0: i32) -> (i32, i32) {
    %c0_i32 = arith.constant 0 : i32
    %c0_i32_0 = arith.constant 0 : i32
    %c0_i32_1 = arith.constant 0 : i32
    return %c0_i32, %c0_i32_0 : i32, i32
  }
  func.func @transform_2(%arg0: i32) -> (i32, i32) {
    %c0_i32 = arith.constant 0 : i32
    %c0_i32_0 = arith.constant 0 : i32
    return %arg0, %c0_i32 : i32, i32
  }
  func.func @transform_3(%arg0: i32) -> (i32, i32) {
    %c0_i32 = arith.constant 0 : i32
    %c0_i32_0 = arith.constant 0 : i32
    return %arg0, %c0_i32 : i32, i32
  }
}

</mosaic_0001>

<bundles_post_ra>
// kernel: tpu_custom_call.1
= control target key start
LH: loop header
LB: loop body
LE: loop exit
PB: predicated region body
PF: predicated region fallthrough
CT: control target
= control target key end

     0   :  { %9 = vsyncpa [#allocation3], 0  ;;  %s1326_s0 = inlined_call_operand.hbm [shape: f32[10,8,32], index: 0, kind: input, shape index: {}]   ;;  %s1327_s1 = inlined_call_operand.vmem [shape: f32[1,32], index: 1, kind: input, shape index: {}]   ;;  %s1328_s2 = inlined_call_operand.hbm [shape: f32[10,32], index: 2, kind: output, shape index: {0}]   ;;  %s1329_s3 = inlined_call_operand.vmem [shape: f32[10,8], index: 3, kind: output, shape index: {1}]  }
   0x1   :  { %11 = vsyncpa [#allocation3 + $0x1], 0 }
   0x2   :  { %12 = vsyncpa [#allocation4], 0 }
   0x3   :  { %14 = vsyncpa [#allocation4 + $0x1], 0  ;;  %s1009_s12 = smov 0   ;;  %s1011_s13 = smov 0  }
   0x4   :  { %s1013_s14 = smov 0   ;;  %s1015_s15 = smov 0  }
   0x5 LB: > { %s1030_s16 = sadd.s32 4294967295, %s982_s15   ;;  %s805_s17 = sadd.s32 4294967294, %s982_s15   ;;  %s982_s15 = sphi %s1015_s15, %s1339_s15   ;;  %s978_s14 = sphi %s1013_s14, %s1338_s14   ;;  %s974_s13 = sphi %s1011_s13, %s1337_s13   ;;  %s970_s12 = sphi %s1009_s12, %s1336_s12  }
   0x6   : > { %s1034_s18 = sadd.s32 1, %s982_s15   ;;  %s27_s19 = sadd.s32 1, %s978_s14 }
   0x7   : > { %s24_s20 = ssub.s32 %s982_s15, %s1034_s18  ;;  %p34_p0 = scmp.ne.s32.totalorder %s978_s14, %s974_s13 }
   0x8   : > { %p25_p1 = scmp.eq.s32.totalorder %s24_s20, 0  ;;  %p35_p2 = scmp.eq.s32.totalorder %s982_s15, 0 }
   0x9   : > { %p40_p3 = scmp.ne.s32.totalorder %s974_s13, %s970_s12  ;;  %p41_p4 = scmp.eq.s32.totalorder %s1030_s16, 0 }
   0xa   : > { %s1046_s21 = scalar_select %p25_p1, %s978_s14, %s27_s19  }
   0xb   : > { %p36_p5 = por %p35_p2, %p34_p0  ;;  %p1048_p6 = por %p41_p4, %p40_p3 }
   0xc   : > { %p85_p7 = scmp.eq.s32.totalorder %s1030_s16, 1  ;;  %p91_p8 = scmp.eq.s32.totalorder %s805_s17, 1 }
   0xd   : > { %p1330_p11 = scmp.ge.s32.totalorder %s982_s15, 2 }
   0xe   : > { %p1053_p9 = por %p85_p7, %p34_p0  ;;  %p1057_p10 = por %p91_p8, %p40_p3 }
   0xf   : > { %136 = sbr.rel (%p1330_p11) target bundleno = 57 (0x39), region = 20 }
  0x10   : > { %s1333_s24 = scalar_select %p1057_p10, 1, 0 }
  0x16   : > { %139 = sbr.rel (!%p36_p5) target bundleno = 57 (0x39), region = 24  ;;  %s140_s25 = sand.u32 (%p36_p5), 1, %s978_s14  }
  0x17   : > { %s809_s26 = sshll.u32 (%p36_p5), %s982_s15, 3  ;;  %s808_s27 = sshll.u32 (%p36_p5), %s140_s25, 6 }
  0x18   : > { %s146_s28 = ssub.s32 (%p36_p5), 10, %s809_s26  ;;  %s1069_s4 = scalar_lea.sflag (%p36_p5), [#allocation3], %s140_s25 }
  0x19   : > { %p147_p12 = scmp.lt.s32.totalorder (%p36_p5), %s146_s28, 8  ;;  %s144_s5 = scalar_lea.vmem (%p36_p5), [#allocation2], %s808_s27 }
  0x1d   : > { %s1341_s28 = smov (!%p147_p12, %s146_s28), 8 }
  0x1e   : > { %s1066_s29 = sshll.u32 %s1341_s28, 7 }
  0x1f   : > { %s151_s30 = ssub.s32 1024, %s1066_s29 }
  0x20   : > { %152 = vsyncadd %s1069_s4, %s151_s30  ;;  %p811_p13 = scmp.ne.s32.totalorder %s1066_s29, 0  ;;  %s824_s6 = sshll.u32 %s982_s15, 10 }
  0x21   : > { %s1077_s9 = scalar_lea.hbm %s1326_s0, %s824_s6  ;;  %s157_s10 = sshll.u32 %s144_s5, 4  ;;  %s1079_s10 = int_to_ptr.vmem [resolvable:$true] %s157_s10 }
  0x22   : > { %s888_s11 = scalar_lea.hbm %s1077_s9, %s1066_s29  ;;  %s892_s20 = scalar_lea.hbm %s1326_s0, 1280 }
  0x23   : > { %p889_p0 = scmp.ne.s32.totalorder %s1077_s9, %s888_s11  ;;  %p893_p3 = scmp.lt.u32.totalorder %s1077_s9, %s1326_s0 }
  0x24   : > { %p894_p4 = scmp.lt.u32.totalorder %s892_s20, %s888_s11  ;;  %p896_p7 = scmp.lt.u32.totalorder %s888_s11, %s1077_s9 }
  0x25   : > { %p890_p1 = pnand %p889_p0, %p811_p13 }
  0x26   : > { %p895_p5 = por %p894_p4, %p893_p3 }
  0x27   : > { %p891_p2 = pneg %p890_p1 }
  0x28   : > { %p897_p8 = por %p896_p7, %p895_p5 }
  0x2a   : > { %p898_p12 = pnand %p897_p8, %p891_p2 }
  0x2c   : > { %901 = shalt.err (!%p898_p12)
}
  0x2d   : > { %s902_s27 = scalar_lea.vmem %s1079_s10, %s1066_s29  ;;  %s984_s28 = smov [#allocation2]  }
  0x2e   : > { %p903_p0 = scmp.ne.s32.totalorder %s1079_s10, %s902_s27  ;;  %s906_s30 = sshll.u32 %s984_s28, 4  ;;  %s907_s30 = int_to_ptr.vmem [resolvable:$false] %s906_s30 }
  0x2f   : > { %s908_s5 = scalar_lea.vmem %s907_s30, 2048  ;;  %p909_p10 = scmp.lt.s32.totalorder %s1079_s10, %s907_s30 }
  0x30   : > { %p904_p1 = pnand %p903_p0, %p811_p13  ;;  %p910_p3 = scmp.lt.s32.totalorder %s908_s5, %s902_s27 }
  0x32   : > { %p905_p11 = pneg %p904_p1  ;;  %p911_p4 = por %p910_p3, %p909_p10 }
  0x34   : > { %p912_p5 = pnand %p911_p4, %p905_p11 }
  0x36   : > { %915 = shalt.err (!%p912_p5)
}
  0x37   : > { %s985_s6 = smov 128   ;;  %s986_s7 = smov 8  }
  0x38   : > { %163 = dma.hbm_to_vmem [thread:$0]  (%p811_p13), %s1077_s9, %s1066_s29, %s1079_s10, %s1069_s4, %s985_s6, %s985_s6, %s986_s7  }
  0x39 PF: > { %p815_p2 = scmp.ge.s32.totalorder %s982_s15, 1  ;;  %p165_p7 = scmp.lt.s32.totalorder %s982_s15, 3 }
  0x3b   : > { %p166_p8 = pnand %p815_p2, %p165_p7 }
  0x3c   : > { %s1109_s8 = sand.u32 (!%p166_p8), 1, %s974_s13  }
  0x3d   : > { %169 = sbr.rel (%p166_p8) target bundleno = 891 (0x37b), region = 28  ;;  %s816_s11 = sshll.u32 (!%p166_p8), %s1109_s8, 6 }
  0x3e   : > { %s172_s17 = scalar_lea.sflag (!%p166_p8), [#allocation3], %s1109_s8  ;;  %s175_s19 = scalar_lea.vmem (!%p166_p8), [#allocation2], %s816_s11 }
  0x44   : > { %961 = dma.done.wait (%p1048_p6), %s172_s17, 1024  }
  0x45   : > { %963 = vsyncadd (%p1048_p6), %s172_s17, 4294966272  ;;  %v819_v0 = vld [vmem:[%s1327_s1] ss:$0 sm:$0xff]  ;;  %vm234_vm0 = vcmask 261120   ;;  %v1122_v2 = vld [vmem:[%s175_s19 + $0x10] sm:$0xff]  ;;  %v267_v25 = vlaneseq  ;;  %vm301_vm1 = vcmask 1041409  }
  0x46   : > { %v1120_v1 = vld [vmem:[%s175_s19] sm:$0xff]  ;;  %v228_v4 = vmul.f32 %v819_v0, %v1122_v2  ;;  %v1126_v5 = vld [vmem:[%s175_s19 + $0x8] sm:$0xff]  ;;  %v1128_v6 = vld [vmem:[%s175_s19 + $0x18] sm:$0xff]  ;;  %vm303_vm2 = vcmask 1042434   ;;  %vm305_vm3 = vcmask 1043459   ;;  %vm307_vm4 = vcmask 1044484  }
  0x47   : > { %v226_v3 = vmul.f32 %v819_v0, %v1120_v1  ;;  %v227_v7 = vmul.f32 %v819_v0, %v1126_v5  ;;  %v229_v8 = vmul.f32 %v819_v0, %v1128_v6  ;;  %v1132_v9 = vld [vmem:[%s175_s19 + $0x20] sm:$0xff]  ;;  %v1134_v10 = vld [vmem:[%s175_s19 + $0x28] sm:$0xff]  ;;  %v1142_v17 = vld [vmem:[%s175_s19 + $0x30] sm:$0xff]  ;;  %v268_v26 = vand.u32 127, %v267_v25  ;;  %p207_p6 = scmp.lt.s32.totalorder %s1030_s16, 1  ;;  %s817_s26 = sshll.u32 %s1109_s8, 3 }
  0x48   : > { %v241_v12 = vsel %vm234_vm0, %v228_v4, 0.0  ;;  %v230_v15 = vmul.f32 %v819_v0, %v1132_v9  ;;  %v231_v16 = vmul.f32 %v819_v0, %v1134_v10  ;;  %v1144_v18 = vld [vmem:[%s175_s19 + $0x38] sm:$0xff]  ;;  %v232_v21 = vmul.f32 %v819_v0, %v1142_v17  ;;  %s821_s27 = sshll.u32 %s1030_s16, 7  ;;  %s195_s28 = scalar_lea.vmem [#allocation5], %s817_s26 }
  0x49   : > { %v235_v11 = vsel %vm234_vm0, %v226_v3, 0.0  ;;  %242 = vadd.xlane.f32.xlu1 %v241_v12  ;;  %v238_v13 = vsel %vm234_vm0, %v227_v7, 0.0  ;;  %v244_v14 = vsel %vm234_vm0, %v229_v8, 0.0  ;;  %v233_v22 = vmul.f32 %v819_v0, %v1144_v18  ;;  %s1245_s22 = scalar_select %p207_p6, %s1030_s16, 1 }
  0x4a   : > { %236 = vadd.xlane.f32.xlu0 %v235_v11  ;;  %v247_v19 = vsel %vm234_vm0, %v230_v15, 0.0  ;;  %v250_v20 = vsel %vm234_vm0, %v231_v16, 0.0  ;;  %v253_v23 = vsel %vm234_vm0, %v232_v21, 0.0  ;;  %v1152_v27 = vshrl.u32 %v267_v25, 7  ;;  %s708_s30 = sshll.u32 %s195_s28, 4  ;;  %s1280_s7 = scalar_lea.hbm %s1328_s2, %s821_s27  ;;  %s1282_s30 = int_to_ptr.vmem [resolvable:$true] %s708_s30 }
  0x4b   : > { %v256_v24 = vsel %vm234_vm0, %v233_v22, 0.0  ;;  %vm309_vm5 = vcmask 1045509   ;;  %vm311_vm6 = vcmask 1046534   ;;  %vm313_vm7 = vcmask 1047559   ;;  %s818_s9 = sshll.u32 %s1245_s22, 3  ;;  %s691_s16 = scalar_lea.sflag [#allocation4], %s1109_s8 }
  0x4c   : > { %v1155_v30 = vsub.s32 %v268_v26, %v1152_v27  ;;  %vm316_vm8 = vcmask 64512   ;;  %v987_v53 = vmov 0   ;;  %v323_v54 = vsub.s32 0, %v1152_v27  ;;  %s210_s25 = scalar_lea.vmem %s1329_s3, %s818_s9  ;;  %s916_s11 = scalar_lea.vmem %s1282_s30, 128 }
  0x4d   : > { %245 = vadd.xlane.f32.xlu1 %v244_v14  ;;  %869 = vset.pattern.permute.xlu0 %v987_v53  ;;  %v327_v55 = vsub.s32 1, %v1152_v27  ;;  %v331_v56 = vsub.s32 2, %v1152_v27  ;;  %v335_v57 = vsub.s32 3, %v1152_v27  ;;  %v339_v62 = vsub.s32 4, %v1152_v27  ;;  %p917_p10 = scmp.ne.s32.totalorder %s1282_s30, %s916_s11  ;;  %s988_s17 = smov [#allocation5]  }
  0x4e   : > { %239 = vadd.xlane.f32.xlu0 %v238_v13  ;;  %868 = vset.pattern.permute.xlu1 %v987_v53  ;;  %v343_v11 = vsub.s32 5, %v1152_v27  ;;  %v347_v15 = vsub.s32 6, %v1152_v27  ;;  %v351_v21 = vsub.s32 7, %v1152_v27  ;;  %s920_s19 = sshll.u32 %s988_s17, 4  ;;  %s921_s19 = int_to_ptr.vmem [resolvable:$false] %s920_s19 }
  0x4f   : > { %p918_p11 = pnand %p917_p10, %p1053_p9  ;;  %s922_s29 = scalar_lea.vmem %s921_s19, 256 }
  0x50   : > { %p923_p12 = scmp.lt.s32.totalorder %s1282_s30, %s921_s19  ;;  %p924_p0 = scmp.lt.s32.totalorder %s922_s29, %s916_s11 }
  0x51   : > { %251 = vadd.xlane.f32.xlu1 %v250_v20  ;;  %p919_p13 = pneg %p918_p11 }
  0x52   : > { %248 = vadd.xlane.f32.xlu0 %v247_v19  ;;  %p925_p1 = por %p924_p0, %p923_p12 }
  0x54   : > { %p926_p3 = pnand %p925_p1, %p919_p13 }
  0x55   : > { %257 = vadd.xlane.f32.xlu1 %v256_v24 }
  0x56   : > { %254 = vadd.xlane.f32.xlu0 %v253_v23 }
  0xd6   : > { %v243_v29 = vpop.xlane.xlu1 %242 }
  0xd7   : > { %v237_v28 = vpop.xlane.xlu0 %236  ;;  %v280_v36 = vrot.slane %v243_v29, %v1155_v30 }
  0xd8   : > { %v272_v33 = vrot.slane %v237_v28, %v1155_v30 }
  0xda   : > { %v246_v32 = vpop.xlane.xlu1 %245 }
  0xdb   : > { %v240_v31 = vpop.xlane.xlu0 %239  ;;  %v284_v35 = vrot.slane %v246_v32, %v1155_v30 }
  0xdc   : > { %v276_v34 = vrot.slane %v240_v31, %v1155_v30 }
  0xde   : > { %v302_v37 = vsel %vm301_vm1, %v276_v34, %v272_v33  ;;  %v252_v40 = vpop.xlane.xlu1 %251 }
  0xdf   : > { %v304_v38 = vsel %vm303_vm2, %v280_v36, %v302_v37  ;;  %v249_v39 = vpop.xlane.xlu0 %248  ;;  %v292_v43 = vrot.slane %v252_v40, %v1155_v30 }
  0xe0   : > { %v306_v41 = vsel %vm305_vm3, %v284_v35, %v304_v38  ;;  %v288_v42 = vrot.slane %v249_v39, %v1155_v30 }
  0xe2   : > { %v308_v44 = vsel %vm307_vm4, %v288_v42, %v306_v41  ;;  %v258_v46 = vpop.xlane.xlu1 %257 }
  0xe3   : > { %v255_v45 = vpop.xlane.xlu0 %254  ;;  %v300_v48 = vrot.slane %v258_v46, %v1155_v30  ;;  %v310_v49 = vsel %vm309_vm5, %v292_v43, %v308_v44 }
  0xe4   : > { %v296_v47 = vrot.slane %v255_v45, %v1155_v30 }
  0xe6   : > { %v312_v50 = vsel %vm311_vm6, %v296_v47, %v310_v49 }
  0xe7   : > { %v314_v51 = vsel %vm313_vm7, %v300_v48, %v312_v50 }
  0xe8   : > { %v317_v52 = vsel %vm316_vm8, %v314_v51, -inf }
  0xe9   : > { %318 = vmax.xlane.f32.xlu0 %v317_v52 }
 0x176   : > { %v319_v58 = vpop.xlane.xlu0 %318 }
 0x177   : > { %v324_v59 = vrot.slane %v319_v58, %v323_v54  ;;  %v328_v60 = vrot.slane %v319_v58, %v327_v55  ;;  %v332_v61 = vrot.slane %v319_v58, %v331_v56  ;;  %v336_v63 = vrot.slane %v319_v58, %v335_v57 }
 0x178   : > { %v340_v12 = vrot.slane %v319_v58, %v339_v62  ;;  %v344_v16 = vrot.slane %v319_v58, %v343_v11  ;;  %v348_v22 = vrot.slane %v319_v58, %v347_v15 }
 0x179   : > { %v361_v0 = vsub.f32 %v237_v28, %v324_v59  ;;  %v362_v3 = vsub.f32 %v240_v31, %v328_v60  ;;  %v363_v4 = vsub.f32 %v243_v29, %v332_v61  ;;  %v364_v13 = vsub.f32 %v246_v32, %v336_v63 }
 0x17a   : > { %v365_v19 = vsub.f32 %v249_v39, %v340_v12  ;;  %v366_v23 = vsub.f32 %v252_v40, %v344_v16  ;;  %v352_v28 = vrot.slane %v319_v58, %v351_v21  ;;  %v367_v29 = vsub.f32 %v255_v45, %v348_v22 }
 0x17b   : > { %v369_v7 = vmul.f32 1.442695, %v361_v0  ;;  %v371_v8 = vmul.f32 1.442695, %v362_v3  ;;  %v373_v14 = vmul.f32 1.442695, %v363_v4 }
 0x17c   : > { %v375_v20 = vmul.f32 1.442695, %v364_v13  ;;  %v377_v24 = vmul.f32 1.442695, %v365_v19  ;;  %v379_v31 = vmul.f32 1.442695, %v366_v23  ;;  %v368_v33 = vsub.f32 %v258_v46, %v352_v28 }
 0x17d   : > { %870 = vpow2.f32 %v369_v7  ;;  %v381_v34 = vmul.f32 1.442695, %v367_v29 }
 0x17e   : > { %872 = vpow2.f32 %v371_v8  ;;  %v383_v36 = vmul.f32 1.442695, %v368_v33 }
 0x17f   : > { %874 = vpow2.f32 %v373_v14 }
 0x180   : > { %876 = vpow2.f32 %v375_v20 }
 0x181   : > { %878 = vpow2.f32 %v377_v24 }
 0x182   : > { %880 = vpow2.f32 %v379_v31 }
 0x183   : > { %882 = vpow2.f32 %v381_v34 }
 0x184   : > { %884 = vpow2.f32 %v383_v36 }
 0x187   : > { %v871_v25 = vpop.eup %870 }
 0x188   : > { %v873_v26 = vpop.eup %872  ;;  %394 = vperm.xlu1 %868, %v871_v25  }
 0x189   : > { %397 = vperm.xlu0 %869, %v873_v26   ;;  %v875_v32 = vpop.eup %874 }
 0x18a   : > { %v877_v35 = vpop.eup %876 }
 0x18b   : > { %v879_v37 = vpop.eup %878 }
 0x18c   : > { %400 = vperm.xlu1 %868, %v875_v32   ;;  %v881_v38 = vpop.eup %880 }
 0x18d   : > { %v883_v39 = vpop.eup %882 }
 0x18e   : > { %v885_v40 = vpop.eup %884 }
 0x190   : > { %403 = vperm.xlu1 %868, %v877_v35  }
 0x194   : > { %406 = vperm.xlu1 %868, %v879_v37  }
 0x198   : > { %409 = vperm.xlu1 %868, %v881_v38  }
 0x19c   : > { %412 = vperm.xlu1 %868, %v883_v39  }
 0x1a0   : > { %415 = vperm.xlu1 %868, %v885_v40  }
 0x207   : > { %v395_v41 = vpop.permute.xlu1 %394 }
 0x208   : > { %v398_v45 = vpop.permute.xlu0 %397  ;;  %v420_v48 = vrot.slane %v395_v41, %v1155_v30 }
 0x209   : > { %v424_v47 = vrot.slane %v398_v45, %v1155_v30 }
 0x20b   : > { %v401_v42 = vpop.permute.xlu1 %400  ;;  %v449_v53 = vsel %vm301_vm1, %v424_v47, %v420_v48 }
 0x20c   : > { %v428_v49 = vrot.slane %v401_v42, %v1155_v30 }
 0x20e   : > { %v450_v59 = vsel %vm303_vm2, %v428_v49, %v449_v53 }
 0x20f   : > { %v404_v43 = vpop.permute.xlu1 %403 }
 0x210   : > { %v432_v50 = vrot.slane %v404_v43, %v1155_v30 }
 0x212   : > { %v451_v61 = vsel %vm305_vm3, %v432_v50, %v450_v59 }
 0x213   : > { %v407_v44 = vpop.permute.xlu1 %406 }
 0x214   : > { %v436_v51 = vrot.slane %v407_v44, %v1155_v30 }
 0x216   : > { %v452_v63 = vsel %vm307_vm4, %v436_v51, %v451_v61 }
 0x217   : > { %v410_v46 = vpop.permute.xlu1 %409 }
 0x218   : > { %v440_v58 = vrot.slane %v410_v46, %v1155_v30 }
 0x21a   : > { %v453_v3 = vsel %vm309_vm5, %v440_v58, %v452_v63 }
 0x21b   : > { %v413_v52 = vpop.permute.xlu1 %412 }
 0x21c   : > { %v444_v60 = vrot.slane %v413_v52, %v1155_v30 }
 0x21e   : > { %v454_v7 = vsel %vm311_vm6, %v444_v60, %v453_v3 }
 0x21f   : > { %v416_v0 = vpop.permute.xlu1 %415 }
 0x220   : > { %v448_v4 = vrot.slane %v416_v0, %v1155_v30 }
 0x222   : > { %v455_v8 = vsel %vm313_vm7, %v448_v4, %v454_v7 }
 0x223   : > { %v457_v12 = vsel %vm316_vm8, %v455_v8, 0.0 }
 0x224   : > { %458 = vadd.xlane.f32.xlu1 %v457_v12 }
 0x2b1   : > { %v459_v13 = vpop.xlane.xlu1 %458 }
 0x2b2   : > { %886 = vrcp.f32 %v459_v13 }
 0x2bc   : > { %v887_v14 = vpop.eup %886 }
 0x2bd   : > { %v467_v16 = vrot.slane %v887_v14, %v323_v54  ;;  %v471_v20 = vrot.slane %v887_v14, %v327_v55  ;;  %v475_v23 = vrot.slane %v887_v14, %v331_v56  ;;  %v479_v28 = vrot.slane %v887_v14, %v335_v57 }
 0x2be   : > { %v483_v31 = vrot.slane %v887_v14, %v339_v62  ;;  %v487_v55 = vrot.slane %v887_v14, %v343_v11  ;;  %v491_v56 = vrot.slane %v887_v14, %v347_v15  ;;  %v495_v57 = vrot.slane %v887_v14, %v351_v21 }
 0x2bf   : > { %v504_v19 = vmul.f32 %v871_v25, %v467_v16  ;;  %v505_v22 = vmul.f32 %v873_v26, %v471_v20  ;;  %v506_v24 = vmul.f32 %v875_v32, %v475_v23  ;;  %v507_v29 = vmul.f32 %v877_v35, %v479_v28 }
 0x2c0   : > { %v508_v54 = vmul.f32 %v879_v37, %v483_v31  ;;  %v509_v25 = vmul.f32 %v881_v38, %v487_v55  ;;  %v510_v26 = vmul.f32 %v883_v39, %v491_v56  ;;  %v511_v32 = vmul.f32 %v885_v40, %v495_v57 }
 0x2c1   : > { %521 = vperm.xlu0 %869, %v504_v19  }
 0x2c5   : > { %524 = vperm.xlu0 %869, %v505_v22  }
 0x2c9   : > { %527 = vperm.xlu0 %869, %v506_v24  }
 0x2cd   : > { %530 = vperm.xlu0 %869, %v507_v29  }
 0x2d1   : > { %533 = vperm.xlu0 %869, %v508_v54  }
 0x2d5   : > { %536 = vperm.xlu0 %869, %v509_v25  }
 0x2d9   : > { %539 = vperm.xlu0 %869, %v510_v26  }
 0x2dd   : > { %542 = vperm.xlu0 %869, %v511_v32  }
 0x340   : > { %v522_v33 = vpop.permute.xlu0 %521 }
 0x341   : > { %v601_v35 = vmul.f32 %v522_v33, %v1120_v1  ;;  %v547_v51 = vrot.slane %v522_v33, %v1155_v30 }
 0x343   : > { %v609_v37 = vsel %vm234_vm0, %v601_v35, 0.0 }
 0x344   : > { %v525_v62 = vpop.permute.xlu0 %524  ;;  %v610_v40 = vrot.slane %v609_v37, 4 }
 0x345   : > { %v602_v34 = vmul.f32 %v525_v62, %v1126_v5 }
 0x346   : > { %v611_v44 = vadd.f32 %v610_v40, %v609_v37 }
 0x347   : > { %v616_v15 = vsel %vm234_vm0, %v602_v34, 0.0 }
 0x348   : > { %v528_v11 = vpop.permute.xlu0 %527  ;;  %v617_v39 = vrot.slane %v616_v15, 4 }
 0x349   : > { %v603_v36 = vmul.f32 %v528_v11, %v1122_v2  ;;  %v555_v53 = vrot.slane %v528_v11, %v1155_v30 }
 0x34a   : > { %v618_v2 = vadd.f32 %v617_v39, %v616_v15 }
 0x34b   : > { %v623_v27 = vsel %vm234_vm0, %v603_v36, 0.0 }
 0x34c   : > { %v531_v21 = vpop.permute.xlu0 %530  ;;  %v624_v41 = vrot.slane %v623_v27, 4  ;;  %v619_v52 = vrot.slane %v618_v2, 2 }
 0x34d   : > { %v604_v38 = vmul.f32 %v531_v21, %v1128_v6  ;;  %v551_v6 = vrot.slane %v525_v62, %v1155_v30  ;;  %v559_v60 = vrot.slane %v531_v21, %v1155_v30 }
 0x34e   : > { %v625_v45 = vadd.f32 %v624_v41, %v623_v27  ;;  %v620_v13 = vadd.f32 %v619_v52, %v618_v2 }
 0x34f   : > { %v630_v5 = vsel %vm234_vm0, %v604_v38, 0.0  ;;  %v576_v4 = vsel %vm301_vm1, %v551_v6, %v547_v51 }
 0x350   : > { %v631_v42 = vrot.slane %v630_v5, 4  ;;  %v534_v1 = vpop.permute.xlu0 %533  ;;  %v626_v59 = vrot.slane %v625_v45, 2  ;;  %v577_v14 = vsel %vm303_vm2, %v555_v53, %v576_v4  ;;  %v621_v57 = vrot.slane %v620_v13, 1 }
 0x351   : > { %v605_v43 = vmul.f32 %v534_v1, %v1132_v9  ;;  %v612_v9 = vrot.slane %v611_v44, 2  ;;  %v563_v0 = vrot.slane %v534_v1, %v1155_v30  ;;  %v578_v23 = vsel %vm305_vm3, %v559_v60, %v577_v14 }
 0x352   : > { %v632_v47 = vadd.f32 %v631_v42, %v630_v5  ;;  %v627_v22 = vadd.f32 %v626_v59, %v625_v45  ;;  %v622_v21 = vadd.f32 %v621_v57, %v620_v13 }
 0x353   : > { %v637_v46 = vsel %vm234_vm0, %v605_v43, 0.0  ;;  %v613_v20 = vadd.f32 %v612_v9, %v611_v44  ;;  %v579_v29 = vsel %vm307_vm4, %v563_v0, %v578_v23 }
 0x354   : > { %v638_v48 = vrot.slane %v637_v46, 4  ;;  %v537_v49 = vpop.permute.xlu0 %536  ;;  %v633_v63 = vrot.slane %v632_v47, 2  ;;  %v628_v34 = vrot.slane %v627_v22, 1 }
 0x355   : > { %v606_v50 = vmul.f32 %v537_v49, %v1134_v10  ;;  %v567_v8 = vrot.slane %v537_v49, %v1155_v30  ;;  %v614_v36 = vrot.slane %v613_v20, 1 }
 0x356   : > { %v639_v58 = vadd.f32 %v638_v48, %v637_v46  ;;  %v634_v28 = vadd.f32 %v633_v63, %v632_v47  ;;  %v629_v40 = vadd.f32 %v628_v34, %v627_v22 }
 0x357   : > { %v644_v61 = vsel %vm234_vm0, %v606_v50, 0.0  ;;  %v580_v25 = vsel %vm309_vm5, %v567_v8, %v579_v29  ;;  %v615_v41 = vadd.f32 %v614_v36, %v613_v20 }
 0x358   : > { %v645_v3 = vrot.slane %v644_v61, 4  ;;  %v540_v10 = vpop.permute.xlu0 %539  ;;  %v640_v7 = vrot.slane %v639_v58, 2  ;;  %v635_v15 = vrot.slane %v634_v28, 1 }
 0x359   : > { %v607_v12 = vmul.f32 %v540_v10, %v1142_v17  ;;  %v571_v19 = vrot.slane %v540_v10, %v1155_v30  ;;  %v681_v2 = vsel %vm301_vm1, %v622_v21, %v615_v41 }
 0x35a   : > { %v646_v16 = vadd.f32 %v645_v3, %v644_v61  ;;  %v641_v17 = vadd.f32 %v640_v7, %v639_v58  ;;  %v636_v5 = vadd.f32 %v635_v15, %v634_v28  ;;  %v682_v46 = vsel %vm303_vm2, %v629_v40, %v681_v2 }
 0x35b   : > { %v651_v24 = vsel %vm234_vm0, %v607_v12, 0.0  ;;  %v581_v33 = vsel %vm311_vm6, %v571_v19, %v580_v25 }
 0x35c   : > { %v647_v31 = vrot.slane %v646_v16, 2  ;;  %v652_v54 = vrot.slane %v651_v24, 4  ;;  %v543_v55 = vpop.permute.xlu0 %542  ;;  %v683_v48 = vsel %vm305_vm3, %v636_v5, %v682_v46 }
 0x35d   : > { %v575_v56 = vrot.slane %v543_v55, %v1155_v30  ;;  %v608_v26 = vmul.f32 %v543_v55, %v1144_v18  ;;  %v642_v30 = vrot.slane %v641_v17, 1 }
 0x35e   : > { %v648_v32 = vadd.f32 %v647_v31, %v646_v16  ;;  %v653_v62 = vadd.f32 %v652_v54, %v651_v24 }
 0x35f   : > { %v582_v35 = vsel %vm313_vm7, %v575_v56, %v581_v33  ;;  %v658_v11 = vsel %vm234_vm0, %v608_v26, 0.0  ;;  %v643_v43 = vadd.f32 %v642_v30, %v641_v17 }
 0x360   : > { %v654_v37 = vrot.slane %v653_v62, 2  ;;  %584 = vst.msk [vmem:[%s210_s25] sm:$0xff] %vm316_vm8, %v582_v35  ;;  %v659_v27 = vrot.slane %v658_v11, 4  ;;  %v649_v18 = vrot.slane %v648_v32, 1 }
 0x361   : > { %v684_v6 = vsel %vm307_vm4, %v643_v43, %v683_v48 }
 0x362   : > { %v655_v38 = vadd.f32 %v654_v37, %v653_v62  ;;  %v660_v39 = vadd.f32 %v659_v27, %v658_v11  ;;  %v650_v44 = vadd.f32 %v649_v18, %v648_v32 }
 0x364   : > { %v656_v42 = vrot.slane %v655_v38, 1  ;;  %v661_v1 = vrot.slane %v660_v39, 2  ;;  %v685_v50 = vsel %vm309_vm5, %v650_v44, %v684_v6 }
 0x366   : > { %v662_v45 = vadd.f32 %v661_v1, %v660_v39  ;;  %v657_v47 = vadd.f32 %v656_v42, %v655_v38 }
 0x368   : > { %v663_v49 = vrot.slane %v662_v45, 1  ;;  %v686_v52 = vsel %vm311_vm6, %v657_v47, %v685_v50 }
 0x36a   : > { %v664_v51 = vadd.f32 %v663_v49, %v662_v45 }
 0x36c   : > { %v687_v53 = vsel %vm313_vm7, %v664_v51, %v686_v52 }
 0x36d   : > { %689 = vst.msk [vmem:[%s195_s28] sm:$0xff] %vm234_vm0, %v687_v53 }
 0x36e   : > { %929 = shalt.err (!%p926_p3)
}
 0x36f   : > { %s930_s8 = scalar_lea.hbm %s1280_s7, 128  ;;  %s934_s9 = scalar_lea.hbm %s1328_s2, 256 }
 0x370   : > { %p931_p4 = scmp.ne.s32.totalorder %s1280_s7, %s930_s8  ;;  %p935_p7 = scmp.lt.u32.totalorder %s1280_s7, %s1328_s2 }
 0x371   : > { %p936_p8 = scmp.lt.u32.totalorder %s934_s9, %s930_s8  ;;  %p938_p10 = scmp.lt.u32.totalorder %s930_s8, %s1280_s7 }
 0x372   : > { %p932_p5 = pnand %p931_p4, %p1053_p9 }
 0x373   : > { %p937_p6 = por %p936_p8, %p935_p7 }
 0x374   : > { %p933_p2 = pneg %p932_p5 }
 0x375   : > { %p939_p11 = por %p938_p10, %p937_p6 }
 0x377   : > { %p940_p13 = pnand %p939_p11, %p933_p2 }
 0x379   : > { %943 = shalt.err (!%p940_p13)
}
 0x37a   : > { %826 = dma.vmem_to_hbm [thread:$0]  (%p1053_p9), %s1282_s30, 128, %s1280_s7, %s691_s16  }
 0x37b PF: > { %s723_s25 = sand.u32 1, %s970_s12   ;;  %p1334_p12 = scmp.ne.s32.totalorder %s1333_s24, 0 }
 0x37c   : > { %p1335_p0 = scmp.ge.s32.totalorder %s982_s15, 2  ;;  %s724_s26 = scalar_lea.sflag [#allocation4], %s723_s25 }
 0x37e   : > { %p829_p1 = pnand %p1335_p0, %p1334_p12 }
 0x380   : > { %965 = dma.done.wait (!%p829_p1), %s724_s26, 128  }
 0x381   : > { %967 = vsyncadd (!%p829_p1), %s724_s26, 4294967168  ;;  %p17_p3 = scmp.ge.s32.totalorder %s1034_s18, 4   ;;  %s1336_s12 = smov %s974_s13 }
 0x382   : > { %s1337_s13 = smov %s978_s14  ;;  %s1338_s14 = smov %s1046_s21 }
 0x383   : > { %s1339_s15 = smov %s1034_s18  ;;  %19 = sbr.rel (!%p17_p3) target bundleno = 5 (0x5), region = 85 }
 0x38a   :  { %736 = vsyncpa [#allocation3], 1 }
 0x38b   :  { %738 = vsyncpa [#allocation3 + $0x1], 1 }
 0x38c   :  { %739 = vsyncpa [#allocation4], 1 }
 0x38d   :  { %741 = vsyncpa [#allocation4 + $0x1], 1 }

</bundles_post_ra>
